<compile_context>
chip_gen: v7x
topology: tpu7x:2x2x1
jax: 0.10.0
libtpu: 0.0.40
codegen_flags: <defaults>
</compile_context>

<pallas_src>
import math
import functools

import jax
import jax.numpy as jnp
from jax import lax
from jax.experimental import pallas as pl
from jax.experimental.pallas import tpu as pltpu


_FMIX_C1 = 0x85EBCA6B
_FMIX_C2 = 0xC2B2AE35
_GOLDEN = 0x9E3779B9


# ----------------------------------------------------------------------------
# Helpers
# ----------------------------------------------------------------------------
def _tile_lanes(v, reps: int):
    """Repeat `v` `reps` times along the last (lane) axis with O(log reps) concats."""
    if reps == 1:
        return v
    half = _tile_lanes(v, reps // 2)
    out = jnp.concatenate([half, half], axis=-1)
    if reps % 2:
        out = jnp.concatenate([out, v], axis=-1)
    return out


# ----------------------------------------------------------------------------
# Kernel
# ----------------------------------------------------------------------------
def _pos_enc_kernel(x_ref, pe_ref, o_ref, *, batch: int, train: bool,
                    p: float, seed: int):
    # x_ref : (TS, B*D)  -- row = seq position, lanes = batch-major [b, d] concat
    # pe_ref: (TS, D)
    TS, W = x_ref.shape

    pe_t = _tile_lanes(pe_ref[...], batch)        # (TS, W), small (1/B of x)
    y = x_ref[...] + pe_t

    if train and p > 0.0:
        # Counter-based hash dropout: murmur3 fmix32 of the global element id.
        # Pure VPU integer ops (xor/shift/mul); keep = (hash >= round(p * 2^32))
        # => P(keep) = 1 - p. Runs entirely under the DMA shadow.
        r = lax.broadcasted_iota(jnp.int32, (TS, W), 0)
        c = lax.broadcasted_iota(jnp.int32, (TS, W), 1)
        gid = (pl.program_id(0) * TS + r) * W + c
        h = gid.astype(jnp.uint32) + jnp.uint32((seed * _GOLDEN) & 0xFFFFFFFF)
        h = (h ^ (h >> 16)) * jnp.uint32(_FMIX_C1)
        h = (h ^ (h >> 13)) * jnp.uint32(_FMIX_C2)
        h = h ^ (h >> 16)
        threshold = jnp.uint32(min(int(round(p * (2.0 ** 32))), 2 ** 32 - 1))
        keep = h >= threshold
        y = jnp.where(keep, y * (1.0 / (1.0 - p)), jnp.zeros_like(y))

    o_ref[...] = y.astype(o_ref.dtype)


# ----------------------------------------------------------------------------
# Tile selection (VMEM-aware, legal sublane tiles only)
# ----------------------------------------------------------------------------
def _choose_seq_tile(S: int, B: int, D: int, itemsize: int,
                     vmem_budget_bytes: int = 10 * 1024 * 1024) -> int:
    """Largest legal sequence tile whose double-buffered working set fits."""
    # per grid step: 2x x-in + 2x y-out + 2x pe tiles (double buffered)
    bytes_per_seq_row = (4 * B + 2) * D * itemsize
    max_ts = max(1, vmem_budget_bytes // bytes_per_seq_row)
    # Legal sublane block sizes: full extent S, or a divisor of S that is a
    # multiple of 8 (keeps both the (TS, B*D) and (TS, D) blocks aligned).
    cands = [S] + [ts for ts in range(8, S, 8) if S % ts == 0]
    fitting = [ts for ts in cands if ts <= max_ts]
    return max(fitting) if fitting else min(cands)


# ----------------------------------------------------------------------------
# Wrapper
# ----------------------------------------------------------------------------
def positional_encoding(x, pe_table, *, dropout_p: float = 0.1,
                        train: bool = False, seed: int = 0):
    """x: (S, B, D). pe_table: (max_len, 1, D). Returns (S, B, D)."""
    S, B, D = x.shape
    max_len = pe_table.shape[0]
    assert S <= max_len, f"seq_len {S} exceeds max_len {max_len}"
    assert 0.0 <= dropout_p < 1.0, "dropout_p must be in [0, 1)"

    pe = pe_table[:S].reshape(S, D).astype(x.dtype)   # (S, D) lane-dense
    x2 = x.reshape(S, B * D)                          # free contiguous view

    TS = _choose_seq_tile(S, B, D, x.dtype.itemsize)  # sequence tile
    grid = (S // TS,)

    kernel = functools.partial(_pos_enc_kernel, batch=B, train=bool(train),
                               p=float(dropout_p), seed=int(seed))

    cost = pl.CostEstimate(
        flops=2 * S * B * D,
        transcendentals=0,
        bytes_accessed=(2 * S * B * D + S * D) * x.dtype.itemsize,
    )

    y2 = pl.pallas_call(
        kernel,
        out_shape=jax.ShapeDtypeStruct((S, B * D), x.dtype),
        grid=grid,
        in_specs=[
            pl.BlockSpec((TS, B * D), lambda i: (i, 0)),   # x slab tile
            pl.BlockSpec((TS, D), lambda i: (i, 0)),       # pe tile (1/B of x bytes)
        ],
        out_specs=pl.BlockSpec((TS, B * D), lambda i: (i, 0)),
        compiler_params=pltpu.CompilerParams(
            dimension_semantics=("parallel",),             # shard across TCs on v7x
        ),
        cost_estimate=cost,
    )(x2, pe)
    return y2.reshape(S, B, D)


# ----------------------------------------------------------------------------
# Buffer construction — matches the torch __init__
# ----------------------------------------------------------------------------
def build_pe_table(d_model: int, max_len: int = 5000) -> jnp.ndarray:
    position = jnp.arange(max_len, dtype=jnp.float32)[:, None]           # (L, 1)
    div_term = jnp.exp(jnp.arange(0, d_model, 2, dtype=jnp.float32)
                       * (-math.log(10000.0) / d_model))                 # (D/2,)
    pe = jnp.zeros((max_len, 1, d_model), dtype=jnp.float32)
    pe = pe.at[:, 0, 0::2].set(jnp.sin(position * div_term))
    pe = pe.at[:, 0, 1::2].set(jnp.cos(position * div_term))
    return pe


# ----------------------------------------------------------------------------
# Main
# ----------------------------------------------------------------------------
if __name__ == "__main__":
    S, B, D = 8, 2, 128         # seq_len, batch, d_model (small test shapes)
    max_len = 64

    key = jax.random.PRNGKey(0)
    x = jax.random.normal(key, (S, B, D), dtype=jnp.float32)
    pe_table = build_pe_table(D, max_len)
    ref = x + pe_table[:S]

    # Eval mode: dropout is identity -> must match the reference exactly.
    y_eval = jax.block_until_ready(
        positional_encoding(x, pe_table, dropout_p=0.1, train=False))
    assert y_eval.shape == (S, B, D)
    assert jnp.allclose(y_eval, ref, atol=1e-6, rtol=1e-6), "eval-mode mismatch"

    # Train mode: inverted dropout with keep-prob 1 - p.
    p = 0.1
    y_train = jax.block_until_ready(
        positional_encoding(x, pe_table, dropout_p=p, train=True, seed=123))
    assert y_train.shape == (S, B, D)

    kept = y_train != 0.0
    # (a) surviving elements are exactly ref / (1 - p)
    assert jnp.allclose(jnp.where(kept, y_train, 0.0),
                        jnp.where(kept, ref / (1.0 - p), 0.0),
                        atol=1e-5, rtol=1e-5), "kept elements not scaled by 1/(1-p)"
    # (b) empirical keep rate consistent with 1 - p (2048 elems, wide safety band)
    rate = float(jnp.mean(kept.astype(jnp.float32)))
    assert 0.80 <= rate <= 0.98, f"keep rate {rate:.3f} inconsistent with p={p}"

    print("KERNEL_OK")
</pallas_src>

<mosaic_0001>
module attributes {stable_mosaic.version = 11 : i64} {
  func.func @_pos_enc_kernel(%arg0: i32, %arg1: memref<8x256xf32, #tpu.memory_space<vmem>>, %arg2: memref<8x128xf32, #tpu.memory_space<vmem>>, %arg3: memref<8x256xf32, #tpu.memory_space<vmem>>) attributes {dimension_semantics = [#tpu.dimension_semantics<parallel>], iteration_bounds = array<i64: 1>, scalar_prefetch = 0 : i64, scratch_operands = 0 : i64, tpu.core_type = #tpu.core_type<tc>, window_params = [{transform_indices = @transform_0, window_bounds = array<i64: 8, 256>}, {transform_indices = @transform_1, window_bounds = array<i64: 8, 128>}, {transform_indices = @transform_2, window_bounds = array<i64: 8, 256>}]} {
    %c0 = arith.constant 0 : index
    %c0_0 = arith.constant 0 : index
    %0 = vector.load %arg2[%c0, %c0_0] : memref<8x128xf32, #tpu.memory_space<vmem>>, vector<8x128xf32>
    %1 = tpu.concatenate %0, %0 in 1 : vector<8x128xf32>, vector<8x128xf32> -> vector<8x256xf32>
    %c0_1 = arith.constant 0 : index
    %c0_2 = arith.constant 0 : index
    %2 = vector.load %arg1[%c0_1, %c0_2] : memref<8x256xf32, #tpu.memory_space<vmem>>, vector<8x256xf32>
    %3 = arith.addf %2, %1 : vector<8x256xf32>
    %c0_3 = arith.constant 0 : index
    %c0_4 = arith.constant 0 : index
    %4 = vector.load %arg3[%c0_3, %c0_4] : memref<8x256xf32, #tpu.memory_space<vmem>>, vector<8x256xf32>
    tpu.vector_store %arg3[%c0_3, %c0_4], %3 {strides = array<i32>} : memref<8x256xf32, #tpu.memory_space<vmem>>, vector<8x256xf32>,
    return
  }
  func.func @transform_0(%arg0: i32) -> (i32, i32) {
    %c0_i32 = arith.constant 0 : i32
    %c0_i32_0 = arith.constant 0 : i32
    return %arg0, %c0_i32 : i32, i32
  }
  func.func @transform_1(%arg0: i32) -> (i32, i32) {
    %c0_i32 = arith.constant 0 : i32
    %c0_i32_0 = arith.constant 0 : i32
    return %arg0, %c0_i32 : i32, i32
  }
  func.func @transform_2(%arg0: i32) -> (i32, i32) {
    %c0_i32 = arith.constant 0 : i32
    %c0_i32_0 = arith.constant 0 : i32
    return %arg0, %c0_i32 : i32, i32
  }
}

</mosaic_0001>

<bundles_post_ra>
// kernel: tpu_custom_call.1
= control target key start
LH: loop header
LB: loop body
LE: loop exit
PB: predicated region body
PF: predicated region fallthrough
CT: control target
= control target key end

     0   :  { %7 = vsyncpa [#allocation3], 0  ;;  %s188_s0 = inlined_call_operand.hbm [shape: f32[8,256], index: 0, kind: input, shape index: {}]   ;;  %s189_s1 = inlined_call_operand.hbm [shape: f32[8,128], index: 1, kind: input, shape index: {}]   ;;  %s190_s2 = inlined_call_operand.hbm [shape: f32[8,256], index: 2, kind: output, shape index: {}]  }
   0x1   :  { %8 = vsyncpa [#allocation6], 0 }
   0x2   :  { %9 = vsyncpa [#allocation4], 0  ;;  %s134_s9 = smov [#allocation2]   ;;  %s135_s11 = smov [#allocation5]  }
   0x3   :  { %s16_s10 = sshll.u32 %s134_s9, 4  ;;  %s26_s12 = sshll.u32 %s135_s11, 4  ;;  %s17_s10 = int_to_ptr.vmem [resolvable:$true] %s16_s10  ;;  %s27_s12 = int_to_ptr.vmem [resolvable:$true] %s26_s12 }
   0x4   :  { %s62_s15 = scalar_lea.hbm %s188_s0, 256 }
   0x5   :  { %p63_p0 = scmp.ne.s32.totalorder %s188_s0, %s62_s15  ;;  %p66_p1 = scmp.lt.u32.totalorder %s62_s15, %s188_s0 }
   0x7   :  { %p68_p2 = pnand %p66_p1, %p63_p0 }
   0x9   :  { %71 = shalt.err (!%p68_p2)
}
   0xa   :  { %s72_s20 = scalar_lea.vmem %s17_s10, 256  ;;  %p77_p4 = scmp.lt.s32.totalorder %s17_s10, %s17_s10 }
   0xb   :  { %p73_p3 = scmp.ne.s32.totalorder %s17_s10, %s72_s20  ;;  %p78_p5 = scmp.lt.s32.totalorder %s72_s20, %s72_s20 }
   0xd   :  { %p79_p6 = por %p78_p5, %p77_p4 }
   0xf   :  { %p80_p7 = pnand %p79_p6, %p73_p3 }
  0x11   :  { %83 = shalt.err (!%p80_p7)
}
  0x12   :  { %19 = dma.hbm_to_vmem [thread:$0]  %s188_s0, 256, %s17_s10, [#allocation3]  }
  0x13   :  { %s84_s25 = scalar_lea.hbm %s189_s1, 128 }
  0x14   :  { %p85_p8 = scmp.ne.s32.totalorder %s189_s1, %s84_s25  ;;  %p88_p9 = scmp.lt.u32.totalorder %s84_s25, %s189_s1 }
  0x16   :  { %p90_p10 = pnand %p88_p9, %p85_p8 }
  0x18   :  { %93 = shalt.err (!%p90_p10)
}
  0x19   :  { %s94_s30 = scalar_lea.vmem %s27_s12, 128  ;;  %p99_p12 = scmp.lt.s32.totalorder %s27_s12, %s27_s12 }
  0x1a   :  { %p95_p11 = scmp.ne.s32.totalorder %s27_s12, %s94_s30  ;;  %p100_p13 = scmp.lt.s32.totalorder %s94_s30, %s94_s30 }
  0x1c   :  { %p101_p0 = por %p100_p13, %p99_p12 }
  0x1e   :  { %p102_p1 = pnand %p101_p0, %p95_p11 }
  0x20   :  { %105 = shalt.err (!%p102_p1)
}
  0x21   :  { %29 = dma.hbm_to_vmem [thread:$0]  %s189_s1, 128, %s27_s12, [#allocation6]  }
  0x22   :  { %128 = dma.done.wait [#allocation3], 256  }
  0x23   :  { %129 = vsyncadd [#allocation3], 4294967040 }
  0x24   :  { %130 = dma.done.wait [#allocation6], 128  }
  0x25   :  { %131 = vsyncadd [#allocation6], 4294967168  ;;  %s136_s4 = smov [#allocation7]   ;;  %v36_v0 = vld [vmem:[#allocation5] sm:$0xff]  ;;  %v37_v1 = vld [vmem:[#allocation2] sm:$0xff] }
  0x26   :  { %s49_s5 = sshll.u32 %s136_s4, 4  ;;  %v38_v2 = vld [vmem:[#allocation2 + $0x8] sm:$0xff]  ;;  %v39_v3 = vadd.f32 %v37_v1, %v36_v0  ;;  %s50_s5 = int_to_ptr.vmem [resolvable:$true] %s49_s5 }
  0x27   :  { %v40_v4 = vadd.f32 %v38_v2, %v36_v0  ;;  %s106_s6 = scalar_lea.vmem %s50_s5, 256  ;;  %p111_p3 = scmp.lt.s32.totalorder %s50_s5, %s50_s5 }
  0x28   :  { %41 = vst [vmem:[#allocation7] sm:$0xff] %v39_v3  ;;  %p107_p2 = scmp.ne.s32.totalorder %s50_s5, %s106_s6  ;;  %p112_p4 = scmp.lt.s32.totalorder %s106_s6, %s106_s6 }
  0x29   :  { %42 = vst [vmem:[#allocation7 + $0x8] sm:$0xff] %v40_v4 }
  0x2a   :  { %p113_p5 = por %p112_p4, %p111_p3 }
  0x2c   :  { %p114_p6 = pnand %p113_p5, %p107_p2 }
  0x2e   :  { %117 = shalt.err (!%p114_p6)
}
  0x2f   :  { %s118_s8 = scalar_lea.hbm %s190_s2, 256 }
  0x30   :  { %p119_p7 = scmp.ne.s32.totalorder %s190_s2, %s118_s8  ;;  %p122_p8 = scmp.lt.u32.totalorder %s118_s8, %s190_s2 }
  0x32   :  { %p124_p9 = pnand %p122_p8, %p119_p7 }
  0x34   :  { %127 = shalt.err (!%p124_p9)
}
  0x35   :  { %52 = dma.vmem_to_hbm [thread:$0]  %s50_s5, 256, %s190_s2, [#allocation4]  }
  0x36   :  { %132 = dma.done.wait [#allocation4], 256  }
  0x37   :  { %133 = vsyncadd [#allocation4], 4294967040 }
  0x38   :  { %56 = vsyncpa [#allocation3], 1 }
  0x39   :  { %57 = vsyncpa [#allocation6], 1 }
  0x3a   :  { %58 = vsyncpa [#allocation4], 1 }

</bundles_post_ra>
